<compile_context>
chip_gen: v7x
topology: tpu7x:2x2x1
jax: 0.10.0
libtpu: 0.0.40
codegen_flags: <defaults>
</compile_context>

<pallas_src>
import functools

import jax
import jax.numpy as jnp
import numpy as np
from jax.experimental import pallas as pl
from jax.experimental.pallas import tpu as pltpu


def _round_up(x, m):
    return ((x + m - 1) // m) * m


def _pick_tiles(n_rows, n_cols, n_inputs, itemsize,
                input_vmem_budget=12 * 1024 * 1024):
    """Pick (TR, TL, R_pad, L_pad): (8,128)-aligned tiles whose double-buffered
    input footprint stays under `input_vmem_budget` (v7x 64 MiB VMEM safe)."""
    tr = min(_round_up(n_rows, 8), 512)
    r_pad = _round_up(n_rows, tr)
    max_tl = max(128, input_vmem_budget // (2 * n_inputs * tr * itemsize))
    tl = max(128, (max_tl // 128) * 128)
    tl = min(tl, _round_up(n_cols, 128))
    l_pad = _round_up(n_cols, tl)
    return tr, tl, r_pad, l_pad


# --------------------------------------------------------------------------
# Kernels
# --------------------------------------------------------------------------
def _tversky_c2_kernel(beta, p_i_ref, p_j_ref, g_ref, loss_ref,
                       s_pig, s_pi, s_pjg):
    """C == 2 branch: p_i / p_j are the two prediction channels, g is the mask."""
    l = pl.program_id(1)

    @pl.when(l == 0)
    def _init():
        s_pig[...] = jnp.zeros_like(s_pig)
        s_pi[...] = jnp.zeros_like(s_pi)
        s_pjg[...] = jnp.zeros_like(s_pjg)

    p_i = p_i_ref[...].astype(jnp.float32)
    p_j = p_j_ref[...].astype(jnp.float32)
    g = g_ref[...].astype(jnp.float32)

    s_pig[...] += jnp.sum(p_i * g, axis=-1, keepdims=True)
    s_pi[...] += jnp.sum(p_i, axis=-1, keepdims=True)
    s_pjg[...] += jnp.sum(p_j * g, axis=-1, keepdims=True)

    @pl.when(l == pl.num_programs(1) - 1)
    def _finalize():
        pig = s_pig[...]
        num = pig * (1.0 + beta * beta)
        # sum(p_i * (1 - g)) == sum(p_i) - sum(p_i * g)
        den = num + (s_pi[...] - pig) * (beta * beta) + s_pjg[...] * beta + 1e-6
        loss_ref[...] = num * pl.reciprocal(den, approx=True)


def _tversky_c1_kernel(beta, p_ref, g_ref, loss_ref, s_pg, s_p, s_g):
    """C == 1 branch: p_j = 1 - p and g_j = 1 - g are formed algebraically, so
    only two inputs stream from HBM and one multiply per element is needed."""
    l = pl.program_id(1)

    @pl.when(l == 0)
    def _init():
        s_pg[...] = jnp.zeros_like(s_pg)
        s_p[...] = jnp.zeros_like(s_p)
        s_g[...] = jnp.zeros_like(s_g)

    p = p_ref[...].astype(jnp.float32)
    g = g_ref[...].astype(jnp.float32)

    s_pg[...] += jnp.sum(p * g, axis=-1, keepdims=True)
    s_p[...] += jnp.sum(p, axis=-1, keepdims=True)
    s_g[...] += jnp.sum(g, axis=-1, keepdims=True)

    @pl.when(l == pl.num_programs(1) - 1)
    def _finalize():
        pg = s_pg[...]
        num = pg * (1.0 + beta * beta)
        # sum(p*(1-g)) = s_p - s_pg ;  sum((1-p)*g) = s_g - s_pg
        den = num + (s_p[...] - pg) * (beta * beta) + (s_g[...] - pg) * beta + 1e-6
        loss_ref[...] = num * pl.reciprocal(den, approx=True)


# --------------------------------------------------------------------------
# pallas_call wrapper
# --------------------------------------------------------------------------
def _tversky_rows(kernel_body, row_arrays, beta, n_rows_true):
    """Run a tversky row-kernel over (rows, reduce_len) arrays; return the mean
    per-row loss as a scalar."""
    n_rows, n_cols = row_arrays[0].shape
    itemsize = max(int(a.dtype.itemsize) for a in row_arrays)
    tr, tl, r_pad, l_pad = _pick_tiles(n_rows, n_cols, len(row_arrays), itemsize)

    # Zero padding is loss-neutral: padded rows/lanes contribute 0 to all sums.
    padded = [jnp.pad(a, ((0, r_pad - n_rows), (0, l_pad - n_cols)))
              for a in row_arrays]
    grid = (r_pad // tr, l_pad // tl)

    in_bytes = 2 * sum(int(a.dtype.itemsize) for a in padded) * tr * tl
    misc_bytes = (3 + 2) * tr * 128 * 4            # scratch + double-buffered out
    vmem_limit = int(min(48 * 1024 * 1024,
                         max(16 * 1024 * 1024, 2 * (in_bytes + misc_bytes))))

    per_row_loss = pl.pallas_call(
        functools.partial(kernel_body, float(beta)),
        out_shape=jax.ShapeDtypeStruct((r_pad, 1), jnp.float32),
        grid_spec=pltpu.PrefetchScalarGridSpec(
            num_scalar_prefetch=0,
            grid=grid,
            in_specs=[pl.BlockSpec((tr, tl), lambda r, l: (r, l))
                      for _ in padded],
            out_specs=pl.BlockSpec((tr, 1), lambda r, l: (r, 0)),
            scratch_shapes=[pltpu.VMEM((tr, 1), jnp.float32)] * 3,
        ),
        compiler_params=pltpu.CompilerParams(
            # Rows are independent -> "parallel" (lets v7x split over its 2 TCs);
            # the flattened reduce axis carries the accumulators -> "arbitrary".
            dimension_semantics=("parallel", "arbitrary"),
            vmem_limit_bytes=vmem_limit,
        ),
    )(*padded)

    # Padded rows contribute exactly 0, so sum / true-row-count == loss.mean().
    return jnp.sum(per_row_loss) / float(n_rows_true)


# --------------------------------------------------------------------------
# Public API (mirrors tensormonk DiceLoss.forward)
# --------------------------------------------------------------------------
def dice_loss(prediction, targets, loss_type="tversky"):
    """Pallas-TPU forward of DiceLoss. Returns (loss, (top1, top5))."""
    if loss_type == "tversky":
        beta = 2.0
    elif loss_type == "dice":
        beta = 1.0
    else:
        raise NotImplementedError(loss_type)

    n, c, h, w = prediction.shape
    if c == 1:
        # Reference reduces channel (size 1) and H only -> per-(n, w) loss.
        # Put H on lanes: (N,1,H,W) -> (N,W,H) -> (N*W, H).
        p = jnp.transpose(prediction.reshape(n, h, w), (0, 2, 1)).reshape(n * w, h)
        g = jnp.transpose(targets.reshape(n, h, w), (0, 2, 1)).reshape(n * w, h)
        loss = _tversky_rows(_tversky_c1_kernel, [p, g], beta, n * w)
    elif c == 2:
        # Reference reduces H and W -> per-sample loss.
        p_i = prediction[:, 0].reshape(n, h * w)
        p_j = prediction[:, 1].reshape(n, h * w)
        g = targets.reshape(n, h * w)
        loss = _tversky_rows(_tversky_c2_kernel, [p_i, p_j, g], beta, n)
    else:
        raise NotImplementedError("prediction.shape[1] must be 1 or 2")

    top1, top5 = 0.0, 0.0
    return loss, (top1, top5)


# --------------------------------------------------------------------------
# Pure-JAX reference (transcription of the PyTorch module) for verification
# --------------------------------------------------------------------------
def _dice_loss_ref(prediction, targets, beta):
    if prediction.shape[1] == 1:
        p_i, p_j = prediction, 1.0 - prediction
        g_i, g_j = targets, 1.0 - targets
    else:
        p_i, p_j = prediction[:, 0], prediction[:, 1]
        g_i, g_j = targets, 1.0 - targets
    num = (p_i * g_i).sum(1).sum(1) * (1.0 + beta ** 2)
    den = (num + (p_i * g_j).sum(1).sum(1) * (beta ** 2)
           + (p_j * g_i).sum(1).sum(1) * beta)
    loss = num / (den + 1e-6)
    return loss.mean()


if __name__ == "__main__":
    key = jax.random.PRNGKey(0)
    k1, k2, k3, k4 = jax.random.split(key, 4)

    # --- C == 2 branch: softmax-style 2-channel prediction, {0,1} float mask ---
    n, h, w = 2, 16, 16
    pred2 = jax.nn.softmax(jax.random.normal(k1, (n, 2, h, w), jnp.float32), axis=1)
    tgt2 = (jax.random.uniform(k2, (n, h, w)) > 0.5).astype(jnp.float32)
    loss2, (top1, top5) = dice_loss(pred2, tgt2, "tversky")
    loss2 = jax.block_until_ready(loss2)
    ref2 = _dice_loss_ref(pred2, tgt2, 2.0)
    assert np.allclose(np.asarray(loss2), np.asarray(ref2), rtol=5e-3, atol=1e-5), (
        float(loss2), float(ref2))

    # --- C == 1 branch: sigmoid-style single-channel prediction + (N,1,H,W) mask ---
    pred1 = jax.nn.sigmoid(jax.random.normal(k3, (n, 1, h, w), jnp.float32))
    tgt1 = (jax.random.uniform(k4, (n, 1, h, w)) > 0.5).astype(jnp.float32)
    loss1, _ = dice_loss(pred1, tgt1, "dice")
    loss1 = jax.block_until_ready(loss1)
    ref1 = _dice_loss_ref(pred1, tgt1, 1.0)
    assert np.allclose(np.asarray(loss1), np.asarray(ref1), rtol=5e-3, atol=1e-5), (
        float(loss1), float(ref1))

    print("KERNEL_OK")
</pallas_src>

<mosaic_0001>
module attributes {stable_mosaic.version = 11 : i64} {
  func.func @_tversky_c2_kernel(%arg0: i32, %arg1: i32, %arg2: memref<8x256xf32, #tpu.memory_space<vmem>>, %arg3: memref<8x256xf32, #tpu.memory_space<vmem>>, %arg4: memref<8x256xf32, #tpu.memory_space<vmem>>, %arg5: memref<8x1xf32, #tpu.memory_space<vmem>>, %arg6: memref<8x1xf32, #tpu.memory_space<vmem>>, %arg7: memref<8x1xf32, #tpu.memory_space<vmem>>, %arg8: memref<8x1xf32, #tpu.memory_space<vmem>>) attributes {dimension_semantics = [#tpu.dimension_semantics<parallel>, #tpu.dimension_semantics<arbitrary>], iteration_bounds = array<i64: 1, 1>, scalar_prefetch = 0 : i64, scratch_operands = 3 : i64, tpu.core_type = #tpu.core_type<tc>, window_params = [{transform_indices = @transform_0, window_bounds = array<i64: 8, 256>}, {transform_indices = @transform_1, window_bounds = array<i64: 8, 256>}, {transform_indices = @transform_2, window_bounds = array<i64: 8, 256>}, {transform_indices = @transform_3, window_bounds = array<i64: 8, 1>}]} {
    %c0_i32 = arith.constant 0 : i32
    %0 = arith.cmpi eq, %arg1, %c0_i32 : i32
    %1 = arith.extui %0 : i1 to i32
    %c0_i32_0 = arith.constant 0 : i32
    %2 = arith.cmpi ne, %1, %c0_i32_0 : i32
    scf.if %2 {
      %cst_22 = arith.constant 0.000000e+00 : f32
      %26 = vector.broadcast %cst_22 : f32 to vector<8x1xf32>
      %c0_23 = arith.constant 0 : index
      %c0_24 = arith.constant 0 : index
      %27 = vector.load %arg6[%c0_23, %c0_24] : memref<8x1xf32, #tpu.memory_space<vmem>>, vector<8x1xf32>
      tpu.vector_store %arg6[%c0_23, %c0_24], %26 {strides = array<i32>} : memref<8x1xf32, #tpu.memory_space<vmem>>, vector<8x1xf32>,
      %cst_25 = arith.constant 0.000000e+00 : f32
      %28 = vector.broadcast %cst_25 : f32 to vector<8x1xf32>
      %c0_26 = arith.constant 0 : index
      %c0_27 = arith.constant 0 : index
      %29 = vector.load %arg7[%c0_26, %c0_27] : memref<8x1xf32, #tpu.memory_space<vmem>>, vector<8x1xf32>
      tpu.vector_store %arg7[%c0_26, %c0_27], %28 {strides = array<i32>} : memref<8x1xf32, #tpu.memory_space<vmem>>, vector<8x1xf32>,
      %cst_28 = arith.constant 0.000000e+00 : f32
      %30 = vector.broadcast %cst_28 : f32 to vector<8x1xf32>
      %c0_29 = arith.constant 0 : index
      %c0_30 = arith.constant 0 : index
      %31 = vector.load %arg8[%c0_29, %c0_30] : memref<8x1xf32, #tpu.memory_space<vmem>>, vector<8x1xf32>
      tpu.vector_store %arg8[%c0_29, %c0_30], %30 {strides = array<i32>} : memref<8x1xf32, #tpu.memory_space<vmem>>, vector<8x1xf32>,
    } else {
    }
    %c0 = arith.constant 0 : index
    %c0_1 = arith.constant 0 : index
    %3 = vector.load %arg2[%c0, %c0_1] : memref<8x256xf32, #tpu.memory_space<vmem>>, vector<8x256xf32>
    %c0_2 = arith.constant 0 : index
    %c0_3 = arith.constant 0 : index
    %4 = vector.load %arg3[%c0_2, %c0_3] : memref<8x256xf32, #tpu.memory_space<vmem>>, vector<8x256xf32>
    %c0_4 = arith.constant 0 : index
    %c0_5 = arith.constant 0 : index
    %5 = vector.load %arg4[%c0_4, %c0_5] : memref<8x256xf32, #tpu.memory_space<vmem>>, vector<8x256xf32>
    %c0_6 = arith.constant 0 : index
    %c0_7 = arith.constant 0 : index
    %6 = vector.load %arg6[%c0_6, %c0_7] : memref<8x1xf32, #tpu.memory_space<vmem>>, vector<8x1xf32>
    %7 = arith.mulf %3, %5 : vector<8x256xf32>
    %cst = arith.constant dense<0.000000e+00> : vector<8xf32>
    %8 = vector.multi_reduction <add>, %7, %cst [1] : vector<8x256xf32> to vector<8xf32>
    %9 = vector.shape_cast %8 : vector<8xf32> to vector<8x1xf32>
    %10 = arith.addf %6, %9 : vector<8x1xf32>
    %c0_8 = arith.constant 0 : index
    %c0_9 = arith.constant 0 : index
    %11 = vector.load %arg6[%c0_8, %c0_9] : memref<8x1xf32, #tpu.memory_space<vmem>>, vector<8x1xf32>
    tpu.vector_store %arg6[%c0_8, %c0_9], %10 {strides = array<i32>} : memref<8x1xf32, #tpu.memory_space<vmem>>, vector<8x1xf32>,
    %c0_10 = arith.constant 0 : index
    %c0_11 = arith.constant 0 : index
    %12 = vector.load %arg7[%c0_10, %c0_11] : memref<8x1xf32, #tpu.memory_space<vmem>>, vector<8x1xf32>
    %cst_12 = arith.constant dense<0.000000e+00> : vector<8xf32>
    %13 = vector.multi_reduction <add>, %3, %cst_12 [1] : vector<8x256xf32> to vector<8xf32>
    %14 = vector.shape_cast %13 : vector<8xf32> to vector<8x1xf32>
    %15 = arith.addf %12, %14 : vector<8x1xf32>
    %c0_13 = arith.constant 0 : index
    %c0_14 = arith.constant 0 : index
    %16 = vector.load %arg7[%c0_13, %c0_14] : memref<8x1xf32, #tpu.memory_space<vmem>>, vector<8x1xf32>
    tpu.vector_store %arg7[%c0_13, %c0_14], %15 {strides = array<i32>} : memref<8x1xf32, #tpu.memory_space<vmem>>, vector<8x1xf32>,
    %c0_15 = arith.constant 0 : index
    %c0_16 = arith.constant 0 : index
    %17 = vector.load %arg8[%c0_15, %c0_16] : memref<8x1xf32, #tpu.memory_space<vmem>>, vector<8x1xf32>
    %18 = arith.mulf %4, %5 : vector<8x256xf32>
    %cst_17 = arith.constant dense<0.000000e+00> : vector<8xf32>
    %19 = vector.multi_reduction <add>, %18, %cst_17 [1] : vector<8x256xf32> to vector<8xf32>
    %20 = vector.shape_cast %19 : vector<8xf32> to vector<8x1xf32>
    %21 = arith.addf %17, %20 : vector<8x1xf32>
    %c0_18 = arith.constant 0 : index
    %c0_19 = arith.constant 0 : index
    %22 = vector.load %arg8[%c0_18, %c0_19] : memref<8x1xf32, #tpu.memory_space<vmem>>, vector<8x1xf32>
    tpu.vector_store %arg8[%c0_18, %c0_19], %21 {strides = array<i32>} : memref<8x1xf32, #tpu.memory_space<vmem>>, vector<8x1xf32>,
    %c0_i32_20 = arith.constant 0 : i32
    %23 = arith.cmpi eq, %arg1, %c0_i32_20 : i32
    %24 = arith.extui %23 : i1 to i32
    %c0_i32_21 = arith.constant 0 : i32
    %25 = arith.cmpi ne, %24, %c0_i32_21 : i32
    scf.if %25 {
      %c0_22 = arith.constant 0 : index
      %c0_23 = arith.constant 0 : index
      %26 = vector.load %arg6[%c0_22, %c0_23] : memref<8x1xf32, #tpu.memory_space<vmem>>, vector<8x1xf32>
      %cst_24 = arith.constant 5.000000e+00 : f32
      %27 = vector.broadcast %cst_24 : f32 to vector<8x1xf32>
      %28 = arith.mulf %26, %27 : vector<8x1xf32>
      %c0_25 = arith.constant 0 : index
      %c0_26 = arith.constant 0 : index
      %29 = vector.load %arg7[%c0_25, %c0_26] : memref<8x1xf32, #tpu.memory_space<vmem>>, vector<8x1xf32>
      %30 = arith.subf %29, %26 : vector<8x1xf32>
      %cst_27 = arith.constant 4.000000e+00 : f32
      %31 = vector.broadcast %cst_27 : f32 to vector<8x1xf32>
      %32 = arith.mulf %30, %31 : vector<8x1xf32>
      %33 = arith.addf %28, %32 : vector<8x1xf32>
      %c0_28 = arith.constant 0 : index
      %c0_29 = arith.constant 0 : index
      %34 = vector.load %arg8[%c0_28, %c0_29] : memref<8x1xf32, #tpu.memory_space<vmem>>, vector<8x1xf32>
      %cst_30 = arith.constant 2.000000e+00 : f32
      %35 = vector.broadcast %cst_30 : f32 to vector<8x1xf32>
      %36 = arith.mulf %34, %35 : vector<8x1xf32>
      %37 = arith.addf %33, %36 : vector<8x1xf32>
      %cst_31 = arith.constant 9.99999997E-7 : f32
      %38 = vector.broadcast %cst_31 : f32 to vector<8x1xf32>
      %39 = arith.addf %37, %38 : vector<8x1xf32>
      %40 = tpu.reciprocal %39 {approx = true} : vector<8x1xf32> -> vector<8x1xf32>
      %41 = arith.mulf %28, %40 : vector<8x1xf32>
      %c0_32 = arith.constant 0 : index
      %c0_33 = arith.constant 0 : index
      %42 = vector.load %arg5[%c0_32, %c0_33] : memref<8x1xf32, #tpu.memory_space<vmem>>, vector<8x1xf32>
      tpu.vector_store %arg5[%c0_32, %c0_33], %41 {strides = array<i32>} : memref<8x1xf32, #tpu.memory_space<vmem>>, vector<8x1xf32>,
    } else {
    }
    return
  }
  func.func @transform_0(%arg0: i32, %arg1: i32) -> (i32, i32) {
    %c0_i32 = arith.constant 0 : i32
    return %arg0, %arg1 : i32, i32
  }
  func.func @transform_1(%arg0: i32, %arg1: i32) -> (i32, i32) {
    %c0_i32 = arith.constant 0 : i32
    return %arg0, %arg1 : i32, i32
  }
  func.func @transform_2(%arg0: i32, %arg1: i32) -> (i32, i32) {
    %c0_i32 = arith.constant 0 : i32
    return %arg0, %arg1 : i32, i32
  }
  func.func @transform_3(%arg0: i32, %arg1: i32) -> (i32, i32) {
    %c0_i32 = arith.constant 0 : i32
    %c0_i32_0 = arith.constant 0 : i32
    return %arg0, %c0_i32 : i32, i32
  }
}

</mosaic_0001>

<bundles_post_ra>
// kernel: tpu_custom_call.1
= control target key start
LH: loop header
LB: loop body
LE: loop exit
PB: predicated region body
PF: predicated region fallthrough
CT: control target
= control target key end

     0   :  { %8 = vsyncpa [#allocation6], 0  ;;  %s254_s0 = inlined_call_operand.hbm [shape: f32[8,256], index: 0, kind: input, shape index: {}]   ;;  %s255_s1 = inlined_call_operand.hbm [shape: f32[8,256], index: 1, kind: input, shape index: {}]   ;;  %s256_s2 = inlined_call_operand.hbm [shape: f32[8,256], index: 2, kind: input, shape index: {}]   ;;  %s257_s3 = inlined_call_operand.vmem [shape: f32[8,1], index: 3, kind: output, shape index: {}]  }
   0x1   :  { %9 = vsyncpa [#allocation8], 0  ;;  %s184_s12 = smov [#allocation7]   ;;  %s185_s14 = smov [#allocation5]  }
   0x2   :  { %s26_s13 = sshll.u32 %s184_s12, 4  ;;  %s16_s15 = sshll.u32 %s185_s14, 4  ;;  %s27_s13 = int_to_ptr.vmem [resolvable:$true] %s26_s13  ;;  %s17_s15 = int_to_ptr.vmem [resolvable:$true] %s16_s15 }
   0x3   :  { %s114_s18 = scalar_lea.hbm %s255_s1, 256 }
   0x4   :  { %p115_p0 = scmp.ne.s32.totalorder %s255_s1, %s114_s18  ;;  %p118_p1 = scmp.lt.u32.totalorder %s114_s18, %s255_s1 }
   0x6   :  { %p120_p2 = pnand %p118_p1, %p115_p0 }
   0x8   :  { %123 = shalt.err (!%p120_p2)
}
   0x9   :  { %s124_s23 = scalar_lea.vmem %s27_s13, 256  ;;  %p129_p4 = scmp.lt.s32.totalorder %s27_s13, %s27_s13 }
   0xa   :  { %p125_p3 = scmp.ne.s32.totalorder %s27_s13, %s124_s23  ;;  %p130_p5 = scmp.lt.s32.totalorder %s124_s23, %s124_s23 }
   0xc   :  { %p131_p6 = por %p130_p5, %p129_p4 }
   0xe   :  { %p132_p7 = pnand %p131_p6, %p125_p3 }
  0x10   :  { %135 = shalt.err (!%p132_p7)
}
  0x11   :  { %29 = dma.hbm_to_vmem [thread:$0]  %s255_s1, 256, %s27_s13, [#allocation8]  }
  0x12   :  { %s136_s28 = scalar_lea.hbm %s254_s0, 256 }
  0x13   :  { %p137_p8 = scmp.ne.s32.totalorder %s254_s0, %s136_s28  ;;  %p140_p9 = scmp.lt.u32.totalorder %s136_s28, %s254_s0 }
  0x15   :  { %p142_p10 = pnand %p140_p9, %p137_p8 }
  0x17   :  { %145 = shalt.err (!%p142_p10)
}
  0x18   :  { %s146_s6 = scalar_lea.vmem %s17_s15, 256  ;;  %p151_p12 = scmp.lt.s32.totalorder %s17_s15, %s17_s15 }
  0x19   :  { %p147_p11 = scmp.ne.s32.totalorder %s17_s15, %s146_s6  ;;  %p152_p13 = scmp.lt.s32.totalorder %s146_s6, %s146_s6 }
  0x1b   :  { %p153_p0 = por %p152_p13, %p151_p12 }
  0x1d   :  { %p154_p1 = pnand %p153_p0, %p147_p11 }
  0x1f   :  { %157 = shalt.err (!%p154_p1)
}
  0x20   :  { %19 = dma.hbm_to_vmem [thread:$0]  %s254_s0, 256, %s17_s15, [#allocation6]  }
  0x21   :  { %s186_s8 = smov [#allocation9]   ;;  %s158_s12 = scalar_lea.hbm %s256_s2, 256 }
  0x22   :  { %s36_s9 = sshll.u32 %s186_s8, 4  ;;  %p159_p2 = scmp.ne.s32.totalorder %s256_s2, %s158_s12  ;;  %s37_s9 = int_to_ptr.vmem [resolvable:$true] %s36_s9 }
  0x23   :  { %p162_p3 = scmp.lt.u32.totalorder %s158_s12, %s256_s2 }
  0x25   :  { %p164_p4 = pnand %p162_p3, %p159_p2 }
  0x27   :  { %167 = shalt.err (!%p164_p4)
}
  0x28   :  { %s168_s18 = scalar_lea.vmem %s37_s9, 256  ;;  %p173_p6 = scmp.lt.s32.totalorder %s37_s9, %s37_s9 }
  0x29   :  { %p169_p5 = scmp.ne.s32.totalorder %s37_s9, %s168_s18  ;;  %p174_p7 = scmp.lt.s32.totalorder %s168_s18, %s168_s18 }
  0x2b   :  { %p175_p8 = por %p174_p7, %p173_p6 }
  0x2d   :  { %p176_p9 = pnand %p175_p8, %p169_p5 }
  0x2f   :  { %179 = shalt.err (!%p176_p9)
}
  0x30   :  { %39 = dma.hbm_to_vmem [thread:$0]  %s256_s2, 256, %s37_s9, [#allocation8]  }
  0x31   :  { %180 = dma.done.wait [#allocation6], 256  }
  0x32   :  { %181 = vsyncadd [#allocation6], 4294967040 }
  0x33   :  { %182 = dma.done.wait [#allocation8], 512  }
  0x34   :  { %183 = vsyncadd [#allocation8], 4294966784  ;;  %vm53_vm0 = vcmask 7168   ;;  %v187_v0 = vmov 0.0   ;;  %v57_v1 = vld [vmem:[#allocation5] sm:$0xff]  ;;  %v58_v2 = vld [vmem:[#allocation5 + $0x8] sm:$0xff] }
  0x35   :  { %54 = vst.msk [vmem:[#allocation2] sm:$0xff] %vm53_vm0, %v187_v0  ;;  %55 = vst.msk [vmem:[#allocation3] sm:$0xff] %vm53_vm0, %v187_v0  ;;  %v61_v3 = vld [vmem:[#allocation9] sm:$0xff]  ;;  %v62_v4 = vld [vmem:[#allocation9 + $0x8] sm:$0xff]  ;;  %v73_v13 = vadd.f32 %v58_v2, %v57_v1 }
  0x36   :  { %56 = vst.msk [vmem:[#allocation4] sm:$0xff] %vm53_vm0, %v187_v0  ;;  %v64_v5 = vmul.f32 %v61_v3, %v57_v1  ;;  %v59_v6 = vld [vmem:[#allocation7] sm:$0xff]  ;;  %v60_v7 = vld [vmem:[#allocation7 + $0x8] sm:$0xff]  ;;  %v65_v8 = vmul.f32 %v62_v4, %v58_v2 }
  0x37   :  { %v79_v9 = vmul.f32 %v61_v3, %v59_v6  ;;  %v80_v10 = vmul.f32 %v62_v4, %v60_v7 }
  0x38   :  { %v66_v11 = vadd.f32 %v65_v8, %v64_v5 }
  0x39   :  { %v81_v12 = vadd.f32 %v80_v10, %v79_v9 }
  0x3a   :  { %67 = vadd.xlane.f32.xlu0 %v66_v11 }
  0x3b   :  { %82 = vadd.xlane.f32.xlu1 %v81_v12 }
  0x3c   :  { %v63_v14 = vld [vmem:[#allocation2] sm:$0xff]  ;;  %v72_v20 = vld [vmem:[#allocation3] sm:$0xff] }
  0x3d   :  { %v78_v15 = vld [vmem:[#allocation4] sm:$0xff] }
  0x3e   :  { %74 = vadd.xlane.f32.xlu0 %v73_v13 }
  0xc7   :  { %v68_v16 = vpop.xlane.xlu0 %67 }
  0xc8   :  { %v83_v17 = vpop.xlane.xlu1 %82  ;;  %v69_v18 = vadd.f32 %v68_v16, %v63_v14 }
  0xc9   :  { %v84_v19 = vadd.f32 %v83_v17, %v78_v15 }
  0xca   :  { %71 = vst.msk [vmem:[#allocation2] sm:$0xff] %vm53_vm0, %v69_v18 }
  0xcb   :  { %85 = vst.msk [vmem:[#allocation4] sm:$0xff] %vm53_vm0, %v84_v19  ;;  %v75_v21 = vpop.xlane.xlu0 %74 }
  0xcc   :  { %v76_v22 = vadd.f32 %v75_v21, %v72_v20 }
  0xce   :  { %77 = vst.msk [vmem:[#allocation3] sm:$0xff] %vm53_vm0, %v76_v22 }
  0xd1   :  { %v89_v23 = vld [vmem:[#allocation2] sm:$0xff] }
  0xd2   :  { %v95_v25 = vld [vmem:[#allocation4] sm:$0xff]  ;;  %v90_v27 = vmul.f32 5.0, %v89_v23 }
  0xd3   :  { %v96_v29 = vmul.f32 2.0, %v95_v25 }
  0xd5   :  { %v91_v24 = vld [vmem:[#allocation3] sm:$0xff] }
  0xd6   :  { %v92_v26 = vsub.f32 %v91_v24, %v89_v23 }
  0xd8   :  { %v93_v28 = vmul.f32 4.0, %v92_v26 }
  0xda   :  { %v94_v30 = vadd.f32 %v93_v28, %v90_v27 }
  0xdc   :  { %v97_v31 = vadd.f32 %v96_v29, %v94_v30 }
  0xde   :  { %v98_v32 = vadd.f32 1e-06, %v97_v31 }
  0xe0   :  { %112 = vrcp.f32 %v98_v32 }
  0xea   :  { %v113_v33 = vpop.eup %112 }
  0xeb   :  { %v100_v34 = vmul.f32 %v113_v33, %v90_v27 }
  0xed   :  { %101 = vst.msk [vmem:[%s257_s3] sm:$0xff] %vm53_vm0, %v100_v34 }
  0xee   :  { %106 = vsyncpa [#allocation6], 1 }
  0xef   :  { %107 = vsyncpa [#allocation8], 1 }

</bundles_post_ra>
